<compile_context>
chip_gen: v7x
topology: tpu7x:2x2x1
jax: 0.10.0
libtpu: 0.0.40
codegen_flags: <defaults>
</compile_context>

<pallas_src>
import math
import numpy as np
import jax
import jax.numpy as jnp
from jax.experimental import pallas as pl
from jax.experimental.pallas import tpu as pltpu

# ----- model / problem sizes -----
D = 8              # data dimension the flow acts on
H = 32             # hidden width of the masked conditioner MLP
NUM_STEPS = 2      # number of stacked flow steps
PARITY = [False, True]   # alternate feature-order flip between steps (standard MAF stacking)
TB = 128           # batch tile = full 128-lane vreg width

HALF_LOG_2PI = 0.5 * math.log(2.0 * math.pi)


# ---------------------------------------------------------------------------
# Parameter construction (glue, plain JAX/numpy) — deterministic init.
# ---------------------------------------------------------------------------
def _made_masks(d, h):
    """MADE/StrNN-style autoregressive masks (output i depends only on inputs < i)."""
    in_deg = np.arange(1, d + 1)
    hid_deg = (np.arange(h) % max(d - 1, 1)) + 1
    out_deg = np.arange(1, d + 1)
    m1 = (hid_deg[:, None] >= in_deg[None, :]).astype(np.float32)   # (H, D)
    m2 = (hid_deg[:, None] >= hid_deg[None, :]).astype(np.float32)  # (H, H)
    m3 = (out_deg[:, None] > hid_deg[None, :]).astype(np.float32)   # (D, H)
    return jnp.asarray(m1), jnp.asarray(m2), jnp.asarray(m3)


def init_params(key):
    """Masked conditioner weights, stored (out, in) for the transposed (feature-major) layout.

    The s-head gets one extra output row equal to the column-sum of its masked weights and an
    extra bias equal to the sum of its biases, so that row of the MXU result IS the per-step
    log-det contribution sum_d s_d (no in-kernel reduction needed).
    """
    m1, m2, m3 = _made_masks(D, H)
    W1, B1, W2, B2, W3S, B3S, W3T, B3T = [], [], [], [], [], [], [], []
    for k in range(NUM_STEPS):
        keys = jax.random.split(jax.random.fold_in(key, k), 8)
        w1 = 0.1 * jax.random.normal(keys[0], (H, D), jnp.float32) * m1
        b1 = 0.1 * jax.random.normal(keys[1], (H,), jnp.float32)
        w2 = 0.1 * jax.random.normal(keys[2], (H, H), jnp.float32) * m2
        b2 = 0.1 * jax.random.normal(keys[3], (H,), jnp.float32)
        w3s = 0.1 * jax.random.normal(keys[4], (D, H), jnp.float32) * m3
        b3s = 0.1 * jax.random.normal(keys[5], (D,), jnp.float32)
        w3t = 0.1 * jax.random.normal(keys[6], (D, H), jnp.float32) * m3
        b3t = 0.1 * jax.random.normal(keys[7], (D,), jnp.float32)
        # Fold log-det: extra output row / bias = sums of the s head.
        w3s_ext = jnp.concatenate([w3s, jnp.sum(w3s, axis=0, keepdims=True)], axis=0)  # (D+1, H)
        b3s_ext = jnp.concatenate([b3s, jnp.sum(b3s, keepdims=True)], axis=0)          # (D+1,)
        W1.append(w1); B1.append(b1[:, None])
        W2.append(w2); B2.append(b2[:, None])
        W3S.append(w3s_ext); B3S.append(b3s_ext[:, None])
        W3T.append(w3t); B3T.append(b3t[:, None])
    st = lambda xs: jnp.stack(xs, axis=0)
    rev = jnp.asarray(np.fliplr(np.eye(D)).copy(), jnp.float32)     # (D, D) anti-diagonal perm
    ones_row = jnp.ones((1, D), jnp.float32)                        # prior sum via MXU
    return (st(W1), st(B1), st(W2), st(B2), st(W3S), st(B3S), st(W3T), st(B3T), rev, ones_row)


# ---------------------------------------------------------------------------
# Pallas kernel: full flow forward + prior log-prob for one (lane-dense) batch tile.
# Layout: activations are (feature, TB) — features on sublanes, batch on lanes.
# ---------------------------------------------------------------------------
def arflow_kernel(x_ref, w1_ref, b1_ref, w2_ref, b2_ref,
                  w3s_ref, b3s_ref, w3t_ref, b3t_ref, rev_ref, ones_ref,
                  z_ref, stats_ref):
    x = x_ref[...]                                        # (D, TB)
    ld = jnp.zeros((1, x.shape[1]), jnp.float32)

    for k in range(NUM_STEPS):                            # static unroll over flow steps
        h1 = jnp.maximum(
            jnp.dot(w1_ref[k], x, preferred_element_type=jnp.float32) + b1_ref[k], 0.0)
        h2 = jnp.maximum(
            jnp.dot(w2_ref[k], h1, preferred_element_type=jnp.float32) + b2_ref[k], 0.0)
        s_ext = jnp.dot(w3s_ref[k], h2, preferred_element_type=jnp.float32) + b3s_ref[k]  # (D+1, TB)
        t = jnp.dot(w3t_ref[k], h2, preferred_element_type=jnp.float32) + b3t_ref[k]      # (D, TB)
        s = s_ext[:D, :]
        ld = ld + s_ext[D:D + 1, :]                       # folded log-det row — no XLU reduce
        z = x * jnp.exp(s) + t                            # affine AR transform (full-lane VPU/EUP)
        if PARITY[k]:
            # feature-order reversal as an anti-diagonal permutation matmul (MXU),
            # avoiding cross-sublane reversal codegen.
            z = jnp.dot(rev_ref[...], z, preferred_element_type=jnp.float32)
        x = z

    z_ref[...] = x
    # standard Normal prior: sum_d (-0.5 z^2 - 0.5 log 2pi); feature-axis sum on the MXU
    zz_sum = jnp.dot(ones_ref[...], x * x, preferred_element_type=jnp.float32)   # (1, TB)
    plp = -0.5 * zz_sum - D * HALF_LOG_2PI
    # merged lane-dense (2, TB) stats output: row 0 = log_det, row 1 = prior_logprob
    stats_ref[0:1, :] = ld
    stats_ref[1:2, :] = plp


# ---------------------------------------------------------------------------
# Wrapper
# ---------------------------------------------------------------------------
@jax.jit
def ar_flow_model_forward(x, params):
    """x: (B, D) float32 -> (zs (B, D), prior_logprob (B,), log_det (B,))."""
    (W1, B1, W2, B2, W3S, B3S, W3T, B3T, rev, ones_row) = params
    n_batch = x.shape[0]
    n_tiles = pl.cdiv(n_batch, TB)
    b_pad = n_tiles * TB

    # transposed, lane-dense input; zero-pad the batch (padded columns sliced off below)
    xt = jnp.zeros((D, b_pad), jnp.float32).at[:, :n_batch].set(x.T)

    def const_spec(shape):
        nd = len(shape)
        # Grid-invariant index_map: the same weight block is reused for every batch tile.
        # TODO(synk): single-buffer these constant specs if H/D grow toward v7x's 64 MiB VMEM.
        return pl.BlockSpec(shape, lambda i, _nd=nd: (0,) * _nd)

    flops = b_pad * NUM_STEPS * 2 * (H * D + H * H + (2 * D + 1) * H + D * D) + b_pad * 2 * D
    cost = pl.CostEstimate(
        flops=int(flops),
        transcendentals=int(b_pad * NUM_STEPS * D),
        bytes_accessed=int(4 * (xt.size + D * b_pad + 2 * b_pad
                                + W1.size + B1.size + W2.size + B2.size
                                + W3S.size + B3S.size + W3T.size + B3T.size)),
    )

    zt, stats = pl.pallas_call(
        arflow_kernel,
        grid=(n_tiles,),
        in_specs=[
            pl.BlockSpec((D, TB), lambda i: (0, i)),          # x^T, tiled over batch (lanes)
            const_spec(W1.shape), const_spec(B1.shape),
            const_spec(W2.shape), const_spec(B2.shape),
            const_spec(W3S.shape), const_spec(B3S.shape),
            const_spec(W3T.shape), const_spec(B3T.shape),
            const_spec(rev.shape), const_spec(ones_row.shape),
        ],
        out_specs=[
            pl.BlockSpec((D, TB), lambda i: (0, i)),          # zs^T
            pl.BlockSpec((2, TB), lambda i: (0, i)),          # [log_det; prior_logprob]
        ],
        out_shape=[
            jax.ShapeDtypeStruct((D, b_pad), jnp.float32),
            jax.ShapeDtypeStruct((2, b_pad), jnp.float32),
        ],
        compiler_params=pltpu.CompilerParams(dimension_semantics=("parallel",)),
        cost_estimate=cost,
    )(xt, W1, B1, W2, B2, W3S, B3S, W3T, B3T, rev, ones_row)

    zs = zt[:, :n_batch].T
    log_det = stats[0, :n_batch]
    prior_logprob = stats[1, :n_batch]
    # Match the PyTorch return order: (zs, prior_logprob, log_det)
    return zs, prior_logprob, log_det


# ---------------------------------------------------------------------------
# Pure-JAX reference (for correctness check only) — explicit s-split / sum / flip.
# ---------------------------------------------------------------------------
def reference_forward(x, params):
    (W1, B1, W2, B2, W3S, B3S, W3T, B3T, _rev, _ones) = params
    ld = jnp.zeros((x.shape[0],), jnp.float32)
    for k in range(NUM_STEPS):
        h1 = jax.nn.relu(x @ W1[k].T + B1[k][:, 0])
        h2 = jax.nn.relu(h1 @ W2[k].T + B2[k][:, 0])
        s = h2 @ W3S[k][:D].T + B3S[k][:D, 0]
        t = h2 @ W3T[k].T + B3T[k][:, 0]
        z = x * jnp.exp(s) + t
        if PARITY[k]:
            z = z[:, ::-1]
        ld = ld + jnp.sum(s, axis=1)
        x = z
    plp = jnp.sum(-0.5 * x * x - HALF_LOG_2PI, axis=1)
    return x, plp, ld


if __name__ == "__main__":
    key = jax.random.PRNGKey(0)
    kx, kp = jax.random.split(key)
    B = 256                                 # 2 batch tiles of TB=128 -> both v7x TCs get work
    x = jax.random.normal(kx, (B, D), jnp.float32)
    params = init_params(kp)

    zs, prior_logprob, log_det = ar_flow_model_forward(x, params)
    jax.block_until_ready((zs, prior_logprob, log_det))

    zr, pr, lr = reference_forward(x, params)
    assert np.allclose(np.asarray(zs), np.asarray(zr), atol=1e-4, rtol=1e-4)
    assert np.allclose(np.asarray(prior_logprob), np.asarray(pr), atol=1e-4, rtol=1e-4)
    assert np.allclose(np.asarray(log_det), np.asarray(lr), atol=1e-4, rtol=1e-4)

    print("KERNEL_OK")
</pallas_src>

<mosaic_0001>
module attributes {stable_mosaic.version = 11 : i64} {
  func.func @arflow_kernel(%arg0: i32, %arg1: memref<8x128xf32, #tpu.memory_space<vmem>>, %arg2: memref<2x32x8xf32, #tpu.memory_space<vmem>>, %arg3: memref<2x32x1xf32, #tpu.memory_space<vmem>>, %arg4: memref<2x32x32xf32, #tpu.memory_space<vmem>>, %arg5: memref<2x32x1xf32, #tpu.memory_space<vmem>>, %arg6: memref<2x9x32xf32, #tpu.memory_space<vmem>>, %arg7: memref<2x9x1xf32, #tpu.memory_space<vmem>>, %arg8: memref<2x8x32xf32, #tpu.memory_space<vmem>>, %arg9: memref<2x8x1xf32, #tpu.memory_space<vmem>>, %arg10: memref<8x8xf32, #tpu.memory_space<vmem>>, %arg11: memref<1x8xf32, #tpu.memory_space<vmem>>, %arg12: memref<8x128xf32, #tpu.memory_space<vmem>>, %arg13: memref<2x128xf32, #tpu.memory_space<vmem>>) attributes {dimension_semantics = [#tpu.dimension_semantics<parallel>], iteration_bounds = array<i64: 2>, scalar_prefetch = 0 : i64, scratch_operands = 0 : i64, tpu.core_type = #tpu.core_type<tc>, window_params = [{transform_indices = @transform_0, window_bounds = array<i64: 8, 128>}, {pipeline_mode = #tpu.pipeline_mode<synchronous>, transform_indices = @transform_1, window_bounds = array<i64: 2, 32, 8>}, {pipeline_mode = #tpu.pipeline_mode<synchronous>, transform_indices = @transform_2, window_bounds = array<i64: 2, 32, 1>}, {pipeline_mode = #tpu.pipeline_mode<synchronous>, transform_indices = @transform_3, window_bounds = array<i64: 2, 32, 32>}, {pipeline_mode = #tpu.pipeline_mode<synchronous>, transform_indices = @transform_4, window_bounds = array<i64: 2, 32, 1>}, {pipeline_mode = #tpu.pipeline_mode<synchronous>, transform_indices = @transform_5, window_bounds = array<i64: 2, 9, 32>}, {pipeline_mode = #tpu.pipeline_mode<synchronous>, transform_indices = @transform_6, window_bounds = array<i64: 2, 9, 1>}, {pipeline_mode = #tpu.pipeline_mode<synchronous>, transform_indices = @transform_7, window_bounds = array<i64: 2, 8, 32>}, {pipeline_mode = #tpu.pipeline_mode<synchronous>, transform_indices = @transform_8, window_bounds = array<i64: 2, 8, 1>}, {pipeline_mode = #tpu.pipeline_mode<synchronous>, transform_indices = @transform_9, window_bounds = array<i64: 8, 8>}, {pipeline_mode = #tpu.pipeline_mode<synchronous>, transform_indices = @transform_10, window_bounds = array<i64: 1, 8>}, {transform_indices = @transform_11, window_bounds = array<i64: 8, 128>}, {transform_indices = @transform_12, window_bounds = array<i64: 2, 128>}]} {
    %c0 = arith.constant 0 : index
    %c0_0 = arith.constant 0 : index
    %0 = vector.load %arg1[%c0, %c0_0] : memref<8x128xf32, #tpu.memory_space<vmem>>, vector<8x128xf32>
    %cst = arith.constant 0.000000e+00 : f32
    %1 = vector.broadcast %cst : f32 to vector<1x128xf32>
    %c0_1 = arith.constant 0 : index
    %c0_2 = arith.constant 0 : index
    %c0_3 = arith.constant 0 : index
    %2 = vector.load %arg2[%c0_1, %c0_2, %c0_3] : memref<2x32x8xf32, #tpu.memory_space<vmem>>, vector<1x32x8xf32>
    %3 = vector.shape_cast %2 : vector<1x32x8xf32> to vector<32x8xf32>
    %cst_4 = arith.constant dense<0.000000e+00> : vector<32x128xf32>
    %4 = tpu.matmul %3, %0, %cst_4 {dimension_numbers = #tpu.dot_dimension_numbers<[1], [0], [0], [1], [0, 0, 1, 1], [], []>} : vector<32x8xf32>, vector<8x128xf32>, vector<32x128xf32> -> vector<32x128xf32>
    %c0_5 = arith.constant 0 : index
    %c0_6 = arith.constant 0 : index
    %c0_7 = arith.constant 0 : index
    %5 = vector.load %arg3[%c0_5, %c0_6, %c0_7] : memref<2x32x1xf32, #tpu.memory_space<vmem>>, vector<1x32x1xf32>
    %6 = vector.shape_cast %5 : vector<1x32x1xf32> to vector<32x1xf32>
    %7 = vector.broadcast %6 : vector<32x1xf32> to vector<32x128xf32>
    %8 = arith.addf %4, %7 : vector<32x128xf32>
    %cst_8 = arith.constant 0.000000e+00 : f32
    %9 = vector.broadcast %cst_8 : f32 to vector<32x128xf32>
    %10 = arith.maximumf %8, %9 : vector<32x128xf32>
    %c0_9 = arith.constant 0 : index
    %c0_10 = arith.constant 0 : index
    %c0_11 = arith.constant 0 : index
    %11 = vector.load %arg4[%c0_9, %c0_10, %c0_11] : memref<2x32x32xf32, #tpu.memory_space<vmem>>, vector<1x32x32xf32>
    %12 = vector.shape_cast %11 : vector<1x32x32xf32> to vector<32x32xf32>
    %cst_12 = arith.constant dense<0.000000e+00> : vector<32x128xf32>
    %13 = tpu.matmul %12, %10, %cst_12 {dimension_numbers = #tpu.dot_dimension_numbers<[1], [0], [0], [1], [0, 0, 1, 1], [], []>} : vector<32x32xf32>, vector<32x128xf32>, vector<32x128xf32> -> vector<32x128xf32>
    %c0_13 = arith.constant 0 : index
    %c0_14 = arith.constant 0 : index
    %c0_15 = arith.constant 0 : index
    %14 = vector.load %arg5[%c0_13, %c0_14, %c0_15] : memref<2x32x1xf32, #tpu.memory_space<vmem>>, vector<1x32x1xf32>
    %15 = vector.shape_cast %14 : vector<1x32x1xf32> to vector<32x1xf32>
    %16 = vector.broadcast %15 : vector<32x1xf32> to vector<32x128xf32>
    %17 = arith.addf %13, %16 : vector<32x128xf32>
    %cst_16 = arith.constant 0.000000e+00 : f32
    %18 = vector.broadcast %cst_16 : f32 to vector<32x128xf32>
    %19 = arith.maximumf %17, %18 : vector<32x128xf32>
    %c0_17 = arith.constant 0 : index
    %c0_18 = arith.constant 0 : index
    %c0_19 = arith.constant 0 : index
    %20 = vector.load %arg6[%c0_17, %c0_18, %c0_19] : memref<2x9x32xf32, #tpu.memory_space<vmem>>, vector<1x9x32xf32>
    %21 = vector.shape_cast %20 : vector<1x9x32xf32> to vector<9x32xf32>
    %cst_20 = arith.constant dense<0.000000e+00> : vector<9x128xf32>
    %22 = tpu.matmul %21, %19, %cst_20 {dimension_numbers = #tpu.dot_dimension_numbers<[1], [0], [0], [1], [0, 0, 1, 1], [], []>} : vector<9x32xf32>, vector<32x128xf32>, vector<9x128xf32> -> vector<9x128xf32>
    %c0_21 = arith.constant 0 : index
    %c0_22 = arith.constant 0 : index
    %c0_23 = arith.constant 0 : index
    %23 = vector.load %arg7[%c0_21, %c0_22, %c0_23] : memref<2x9x1xf32, #tpu.memory_space<vmem>>, vector<1x9x1xf32>
    %24 = vector.shape_cast %23 : vector<1x9x1xf32> to vector<9x1xf32>
    %25 = vector.broadcast %24 : vector<9x1xf32> to vector<9x128xf32>
    %26 = arith.addf %22, %25 : vector<9x128xf32>
    %c0_24 = arith.constant 0 : index
    %c0_25 = arith.constant 0 : index
    %c0_26 = arith.constant 0 : index
    %27 = vector.load %arg8[%c0_24, %c0_25, %c0_26] : memref<2x8x32xf32, #tpu.memory_space<vmem>>, vector<1x8x32xf32>
    %28 = vector.shape_cast %27 : vector<1x8x32xf32> to vector<8x32xf32>
    %cst_27 = arith.constant dense<0.000000e+00> : vector<8x128xf32>
    %29 = tpu.matmul %28, %19, %cst_27 {dimension_numbers = #tpu.dot_dimension_numbers<[1], [0], [0], [1], [0, 0, 1, 1], [], []>} : vector<8x32xf32>, vector<32x128xf32>, vector<8x128xf32> -> vector<8x128xf32>
    %c0_28 = arith.constant 0 : index
    %c0_29 = arith.constant 0 : index
    %c0_30 = arith.constant 0 : index
    %30 = vector.load %arg9[%c0_28, %c0_29, %c0_30] : memref<2x8x1xf32, #tpu.memory_space<vmem>>, vector<1x8x1xf32>
    %31 = vector.shape_cast %30 : vector<1x8x1xf32> to vector<8x1xf32>
    %32 = vector.broadcast %31 : vector<8x1xf32> to vector<8x128xf32>
    %33 = arith.addf %29, %32 : vector<8x128xf32>
    %34 = vector.extract_strided_slice %26 {offsets = [0, 0], sizes = [8, 128], strides = [1, 1]} : vector<9x128xf32> to vector<8x128xf32>
    %35 = vector.extract_strided_slice %26 {offsets = [8, 0], sizes = [1, 128], strides = [1, 1]} : vector<9x128xf32> to vector<1x128xf32>
    %36 = arith.addf %1, %35 : vector<1x128xf32>
    %37 = math.exp %34 : vector<8x128xf32>
    %38 = arith.mulf %0, %37 : vector<8x128xf32>
    %39 = arith.addf %38, %33 : vector<8x128xf32>
    %c1 = arith.constant 1 : index
    %c0_31 = arith.constant 0 : index
    %c0_32 = arith.constant 0 : index
    %40 = vector.load %arg2[%c1, %c0_31, %c0_32] : memref<2x32x8xf32, #tpu.memory_space<vmem>>, vector<1x32x8xf32>
    %41 = vector.shape_cast %40 : vector<1x32x8xf32> to vector<32x8xf32>
    %cst_33 = arith.constant dense<0.000000e+00> : vector<32x128xf32>
    %42 = tpu.matmul %41, %39, %cst_33 {dimension_numbers = #tpu.dot_dimension_numbers<[1], [0], [0], [1], [0, 0, 1, 1], [], []>} : vector<32x8xf32>, vector<8x128xf32>, vector<32x128xf32> -> vector<32x128xf32>
    %c1_34 = arith.constant 1 : index
    %c0_35 = arith.constant 0 : index
    %c0_36 = arith.constant 0 : index
    %43 = vector.load %arg3[%c1_34, %c0_35, %c0_36] : memref<2x32x1xf32, #tpu.memory_space<vmem>>, vector<1x32x1xf32>
    %44 = vector.shape_cast %43 : vector<1x32x1xf32> to vector<32x1xf32>
    %45 = vector.broadcast %44 : vector<32x1xf32> to vector<32x128xf32>
    %46 = arith.addf %42, %45 : vector<32x128xf32>
    %cst_37 = arith.constant 0.000000e+00 : f32
    %47 = vector.broadcast %cst_37 : f32 to vector<32x128xf32>
    %48 = arith.maximumf %46, %47 : vector<32x128xf32>
    %c1_38 = arith.constant 1 : index
    %c0_39 = arith.constant 0 : index
    %c0_40 = arith.constant 0 : index
    %49 = vector.load %arg4[%c1_38, %c0_39, %c0_40] : memref<2x32x32xf32, #tpu.memory_space<vmem>>, vector<1x32x32xf32>
    %50 = vector.shape_cast %49 : vector<1x32x32xf32> to vector<32x32xf32>
    %cst_41 = arith.constant dense<0.000000e+00> : vector<32x128xf32>
    %51 = tpu.matmul %50, %48, %cst_41 {dimension_numbers = #tpu.dot_dimension_numbers<[1], [0], [0], [1], [0, 0, 1, 1], [], []>} : vector<32x32xf32>, vector<32x128xf32>, vector<32x128xf32> -> vector<32x128xf32>
    %c1_42 = arith.constant 1 : index
    %c0_43 = arith.constant 0 : index
    %c0_44 = arith.constant 0 : index
    %52 = vector.load %arg5[%c1_42, %c0_43, %c0_44] : memref<2x32x1xf32, #tpu.memory_space<vmem>>, vector<1x32x1xf32>
    %53 = vector.shape_cast %52 : vector<1x32x1xf32> to vector<32x1xf32>
    %54 = vector.broadcast %53 : vector<32x1xf32> to vector<32x128xf32>
    %55 = arith.addf %51, %54 : vector<32x128xf32>
    %cst_45 = arith.constant 0.000000e+00 : f32
    %56 = vector.broadcast %cst_45 : f32 to vector<32x128xf32>
    %57 = arith.maximumf %55, %56 : vector<32x128xf32>
    %c1_46 = arith.constant 1 : index
    %c0_47 = arith.constant 0 : index
    %c0_48 = arith.constant 0 : index
    %58 = vector.load %arg6[%c1_46, %c0_47, %c0_48] : memref<2x9x32xf32, #tpu.memory_space<vmem>>, vector<1x9x32xf32>
    %59 = vector.shape_cast %58 : vector<1x9x32xf32> to vector<9x32xf32>
    %cst_49 = arith.constant dense<0.000000e+00> : vector<9x128xf32>
    %60 = tpu.matmul %59, %57, %cst_49 {dimension_numbers = #tpu.dot_dimension_numbers<[1], [0], [0], [1], [0, 0, 1, 1], [], []>} : vector<9x32xf32>, vector<32x128xf32>, vector<9x128xf32> -> vector<9x128xf32>
    %c1_50 = arith.constant 1 : index
    %c0_51 = arith.constant 0 : index
    %c0_52 = arith.constant 0 : index
    %61 = vector.load %arg7[%c1_50, %c0_51, %c0_52] : memref<2x9x1xf32, #tpu.memory_space<vmem>>, vector<1x9x1xf32>
    %62 = vector.shape_cast %61 : vector<1x9x1xf32> to vector<9x1xf32>
    %63 = vector.broadcast %62 : vector<9x1xf32> to vector<9x128xf32>
    %64 = arith.addf %60, %63 : vector<9x128xf32>
    %c1_53 = arith.constant 1 : index
    %c0_54 = arith.constant 0 : index
    %c0_55 = arith.constant 0 : index
    %65 = vector.load %arg8[%c1_53, %c0_54, %c0_55] : memref<2x8x32xf32, #tpu.memory_space<vmem>>, vector<1x8x32xf32>
    %66 = vector.shape_cast %65 : vector<1x8x32xf32> to vector<8x32xf32>
    %cst_56 = arith.constant dense<0.000000e+00> : vector<8x128xf32>
    %67 = tpu.matmul %66, %57, %cst_56 {dimension_numbers = #tpu.dot_dimension_numbers<[1], [0], [0], [1], [0, 0, 1, 1], [], []>} : vector<8x32xf32>, vector<32x128xf32>, vector<8x128xf32> -> vector<8x128xf32>
    %c1_57 = arith.constant 1 : index
    %c0_58 = arith.constant 0 : index
    %c0_59 = arith.constant 0 : index
    %68 = vector.load %arg9[%c1_57, %c0_58, %c0_59] : memref<2x8x1xf32, #tpu.memory_space<vmem>>, vector<1x8x1xf32>
    %69 = vector.shape_cast %68 : vector<1x8x1xf32> to vector<8x1xf32>
    %70 = vector.broadcast %69 : vector<8x1xf32> to vector<8x128xf32>
    %71 = arith.addf %67, %70 : vector<8x128xf32>
    %72 = vector.extract_strided_slice %64 {offsets = [0, 0], sizes = [8, 128], strides = [1, 1]} : vector<9x128xf32> to vector<8x128xf32>
    %73 = vector.extract_strided_slice %64 {offsets = [8, 0], sizes = [1, 128], strides = [1, 1]} : vector<9x128xf32> to vector<1x128xf32>
    %74 = arith.addf %36, %73 : vector<1x128xf32>
    %75 = math.exp %72 : vector<8x128xf32>
    %76 = arith.mulf %39, %75 : vector<8x128xf32>
    %77 = arith.addf %76, %71 : vector<8x128xf32>
    %c0_60 = arith.constant 0 : index
    %c0_61 = arith.constant 0 : index
    %78 = vector.load %arg10[%c0_60, %c0_61] : memref<8x8xf32, #tpu.memory_space<vmem>>, vector<8x8xf32>
    %cst_62 = arith.constant dense<0.000000e+00> : vector<8x128xf32>
    %79 = tpu.matmul %78, %77, %cst_62 {dimension_numbers = #tpu.dot_dimension_numbers<[1], [0], [0], [1], [0, 0, 1, 1], [], []>} : vector<8x8xf32>, vector<8x128xf32>, vector<8x128xf32> -> vector<8x128xf32>
    %c0_63 = arith.constant 0 : index
    %c0_64 = arith.constant 0 : index
    %80 = vector.load %arg12[%c0_63, %c0_64] : memref<8x128xf32, #tpu.memory_space<vmem>>, vector<8x128xf32>
    tpu.vector_store %arg12[%c0_63, %c0_64], %79 {strides = array<i32>} : memref<8x128xf32, #tpu.memory_space<vmem>>, vector<8x128xf32>,
    %c0_65 = arith.constant 0 : index
    %c0_66 = arith.constant 0 : index
    %81 = vector.load %arg11[%c0_65, %c0_66] : memref<1x8xf32, #tpu.memory_space<vmem>>, vector<1x8xf32>
    %82 = arith.mulf %79, %79 : vector<8x128xf32>
    %cst_67 = arith.constant dense<0.000000e+00> : vector<1x128xf32>
    %83 = tpu.matmul %81, %82, %cst_67 {dimension_numbers = #tpu.dot_dimension_numbers<[1], [0], [0], [1], [0, 0, 1, 1], [], []>} : vector<1x8xf32>, vector<8x128xf32>, vector<1x128xf32> -> vector<1x128xf32>
    %cst_68 = arith.constant -5.000000e-01 : f32
    %84 = vector.broadcast %cst_68 : f32 to vector<1x128xf32>
    %85 = arith.mulf %84, %83 : vector<1x128xf32>
    %cst_69 = arith.constant 7.35150814 : f32
    %86 = vector.broadcast %cst_69 : f32 to vector<1x128xf32>
    %87 = arith.subf %85, %86 : vector<1x128xf32>
    %c0_70 = arith.constant 0 : index
    %c0_71 = arith.constant 0 : index
    %88 = vector.load %arg13[%c0_70, %c0_71] : memref<2x128xf32, #tpu.memory_space<vmem>>, vector<1x128xf32>
    tpu.vector_store %arg13[%c0_70, %c0_71], %74 {strides = array<i32>} : memref<2x128xf32, #tpu.memory_space<vmem>>, vector<1x128xf32>,
    %c1_72 = arith.constant 1 : index
    %c0_73 = arith.constant 0 : index
    %89 = vector.load %arg13[%c1_72, %c0_73] : memref<2x128xf32, #tpu.memory_space<vmem>>, vector<1x128xf32>
    tpu.vector_store %arg13[%c1_72, %c0_73], %87 {strides = array<i32>} : memref<2x128xf32, #tpu.memory_space<vmem>>, vector<1x128xf32>,
    return
  }
  func.func @transform_0(%arg0: i32) -> (i32, i32) {
    %c0_i32 = arith.constant 0 : i32
    %c0_i32_0 = arith.constant 0 : i32
    return %c0_i32, %arg0 : i32, i32
  }
  func.func @transform_1(%arg0: i32) -> (i32, i32, i32) {
    %c0_i32 = arith.constant 0 : i32
    %c0_i32_0 = arith.constant 0 : i32
    %c0_i32_1 = arith.constant 0 : i32
    %c0_i32_2 = arith.constant 0 : i32
    return %c0_i32, %c0_i32_0, %c0_i32_1 : i32, i32, i32
  }
  func.func @transform_2(%arg0: i32) -> (i32, i32, i32) {
    %c0_i32 = arith.constant 0 : i32
    %c0_i32_0 = arith.constant 0 : i32
    %c0_i32_1 = arith.constant 0 : i32
    %c0_i32_2 = arith.constant 0 : i32
    return %c0_i32, %c0_i32_0, %c0_i32_1 : i32, i32, i32
  }
  func.func @transform_3(%arg0: i32) -> (i32, i32, i32) {
    %c0_i32 = arith.constant 0 : i32
    %c0_i32_0 = arith.constant 0 : i32
    %c0_i32_1 = arith.constant 0 : i32
    %c0_i32_2 = arith.constant 0 : i32
    return %c0_i32, %c0_i32_0, %c0_i32_1 : i32, i32, i32
  }
  func.func @transform_4(%arg0: i32) -> (i32, i32, i32) {
    %c0_i32 = arith.constant 0 : i32
    %c0_i32_0 = arith.constant 0 : i32
    %c0_i32_1 = arith.constant 0 : i32
    %c0_i32_2 = arith.constant 0 : i32
    return %c0_i32, %c0_i32_0, %c0_i32_1 : i32, i32, i32
  }
  func.func @transform_5(%arg0: i32) -> (i32, i32, i32) {
    %c0_i32 = arith.constant 0 : i32
    %c0_i32_0 = arith.constant 0 : i32
    %c0_i32_1 = arith.constant 0 : i32
    %c0_i32_2 = arith.constant 0 : i32
    return %c0_i32, %c0_i32_0, %c0_i32_1 : i32, i32, i32
  }
  func.func @transform_6(%arg0: i32) -> (i32, i32, i32) {
    %c0_i32 = arith.constant 0 : i32
    %c0_i32_0 = arith.constant 0 : i32
    %c0_i32_1 = arith.constant 0 : i32
    %c0_i32_2 = arith.constant 0 : i32
    return %c0_i32, %c0_i32_0, %c0_i32_1 : i32, i32, i32
  }
  func.func @transform_7(%arg0: i32) -> (i32, i32, i32) {
    %c0_i32 = arith.constant 0 : i32
    %c0_i32_0 = arith.constant 0 : i32
    %c0_i32_1 = arith.constant 0 : i32
    %c0_i32_2 = arith.constant 0 : i32
    return %c0_i32, %c0_i32_0, %c0_i32_1 : i32, i32, i32
  }
  func.func @transform_8(%arg0: i32) -> (i32, i32, i32) {
    %c0_i32 = arith.constant 0 : i32
    %c0_i32_0 = arith.constant 0 : i32
    %c0_i32_1 = arith.constant 0 : i32
    %c0_i32_2 = arith.constant 0 : i32
    return %c0_i32, %c0_i32_0, %c0_i32_1 : i32, i32, i32
  }
  func.func @transform_9(%arg0: i32) -> (i32, i32) {
    %c0_i32 = arith.constant 0 : i32
    %c0_i32_0 = arith.constant 0 : i32
    %c0_i32_1 = arith.constant 0 : i32
    return %c0_i32, %c0_i32_0 : i32, i32
  }
  func.func @transform_10(%arg0: i32) -> (i32, i32) {
    %c0_i32 = arith.constant 0 : i32
    %c0_i32_0 = arith.constant 0 : i32
    %c0_i32_1 = arith.constant 0 : i32
    return %c0_i32, %c0_i32_0 : i32, i32
  }
  func.func @transform_11(%arg0: i32) -> (i32, i32) {
    %c0_i32 = arith.constant 0 : i32
    %c0_i32_0 = arith.constant 0 : i32
    return %c0_i32, %arg0 : i32, i32
  }
  func.func @transform_12(%arg0: i32) -> (i32, i32) {
    %c0_i32 = arith.constant 0 : i32
    %c0_i32_0 = arith.constant 0 : i32
    return %c0_i32, %arg0 : i32, i32
  }
}

</mosaic_0001>

<bundles_post_ra>
// kernel: ar_flow_model_forward.1
= control target key start
LH: loop header
LB: loop body
LE: loop exit
PB: predicated region body
PF: predicated region fallthrough
CT: control target
= control target key end

     0   :  { %s2294_s0 = inlined_call_operand.vmem [shape: f32[8,256], index: 0, kind: input, shape index: {}]   ;;  %s2295_s1 = inlined_call_operand.vmem [shape: f32[2,32,8], index: 1, kind: input, shape index: {}]   ;;  %s2296_s2 = inlined_call_operand.vmem [shape: f32[2,32,1], index: 2, kind: input, shape index: {}]   ;;  %s2297_s3 = inlined_call_operand.vmem [shape: f32[2,32,32], index: 3, kind: input, shape index: {}]   ;;  %s2298_s4 = inlined_call_operand.vmem [shape: f32[2,32,1], index: 4, kind: input, shape index: {}]   ;;  %s2299_s5 = inlined_call_operand.vmem [shape: f32[2,9,32], index: 5, kind: input, shape index: {}]   ;;  %s2300_s6 = inlined_call_operand.vmem [shape: f32[2,9,1], index: 6, kind: input, shape index: {}]   ;;  %s2301_s7 = inlined_call_operand.vmem [shape: f32[2,8,32], index: 7, kind: input, shape index: {}]   ;;  %s2302_s8 = inlined_call_operand.vmem [shape: f32[2,8,1], index: 8, kind: input, shape index: {}]   ;;  %s2303_s9 = inlined_call_operand.vmem [shape: f32[8,8], index: 9, kind: input, shape index: {}]   ;;  %s2304_s10 = inlined_call_operand.vmem [shape: f32[1,8], index: 10, kind: input, shape index: {}]   ;;  %s2305_s11 = inlined_call_operand.hbm [shape: f32[8,256], index: 11, kind: output, shape index: {0}]   ;;  %s2306_s12 = inlined_call_operand.vmem [shape: f32[2,256], index: 12, kind: output, shape index: {1}]  }
   0x1   :  { %2308 = sst [smem:[#allocation7_spill]] %s2294_s0 }
   0x2   :  { %2309 = sst [smem:[#allocation8_spill]] %s2295_s1 }
   0x3   :  { %18 = vsyncpa [#allocation3], 0 }
   0x4   :  { %20 = vsyncpa [#allocation3 + $0x1], 0  ;;  %s2000_s21 = smov 0   ;;  %s2002_s22 = smov 0  }
   0x5   :  { %s2004_s23 = smov 0   ;;  %s2006_s24 = smov 0  }
   0x6 LB: > { %2310 = sst [smem:[#allocation5_spill]] %s1924_s23  ;;  %s2021_s25 = sadd.s32 4294967295, %s1928_s24   ;;  %s1928_s24 = sphi %s2006_s24, %s2320_s24   ;;  %s1924_s23 = sphi %s2004_s23, %s2317_s23   ;;  %s1920_s22 = sphi %s2002_s22, %s2319_s22   ;;  %s1916_s21 = sphi %s2000_s21, %s2318_s21  }
   0x7   : > { %s1565_s26 = sadd.s32 4294967294, %s1928_s24   ;;  %s2025_s27 = sadd.s32 1, %s1928_s24  }
   0x8   : > { %s269_s28 = sadd.s32 1, %s1924_s23  ;;  %s266_s29 = ssub.s32 %s1928_s24, %s2025_s27 }
   0x9   : > { %p279_p0 = scmp.ne.s32.totalorder %s1924_s23, %s1920_s22  ;;  %p267_p1 = scmp.eq.s32.totalorder %s266_s29, 0 }
   0xa   : > { %p280_p2 = scmp.eq.s32.totalorder %s2021_s25, 1  ;;  %p285_p3 = scmp.ne.s32.totalorder %s1920_s22, %s1916_s21 }
   0xb   : > { %p286_p4 = scmp.eq.s32.totalorder %s1565_s26, 1  ;;  %p1568_p7 = scmp.ge.s32.totalorder %s1928_s24, 1 }
   0xc   : > { %s2036_s30 = scalar_select %p267_p1, %s1924_s23, %s269_s28  }
   0xd   : > { %p2038_p5 = por %p280_p2, %p279_p0  ;;  %p2042_p6 = por %p286_p4, %p285_p3 }
   0xe   : > { %2311 = sst [smem:[#allocation6_spill]] %s2036_s30  ;;  %p367_p8 = scmp.lt.s32.totalorder %s1928_s24, 3 }
  0x10   : > { %p368_p9 = pnand %p1568_p7, %p367_p8 }
  0x11   : > { %p412_p10 = scmp.lt.s32.totalorder (!%p368_p9), %s2021_s25, 1  ;;  %s2314_s1 = sld [smem:[#allocation8_spill]] (!%p368_p9)  ;;  %vm449_vm0 = vcmask (!%p368_p9), 64512   ;;  %v1930_v1 = vmov (!%p368_p9), 0   ;;  %v425_v2 = vld [vmem:[%s2296_s2] sm:$0xff] (!%p368_p9)  ;;  %v427_v3 = vld [vmem:[%s2296_s2 + $0x10] sm:$0xff] (!%p368_p9) }
  0x12   : > { %371 = sbr.rel (%p368_p9) target bundleno = 1839 (0x72f), region = 64  ;;  %1860 = vset.pattern.permute.xlu0 (!%p368_p9), %v1930_v1  ;;  %1861 = vset.pattern.permute.xlu1 (!%p368_p9), %v1930_v1  ;;  %v426_v4 = vld [vmem:[%s2296_s2 + $0x8] sm:$0xff] (!%p368_p9)  ;;  %v428_v5 = vld [vmem:[%s2296_s2 + $0x18] sm:$0xff] (!%p368_p9)  ;;  %s2315_s0 = sld [smem:[#allocation7_spill]] (!%p368_p9)  ;;  %v555_v9 = vld [vmem:[%s2298_s4] sm:$0xff] (!%p368_p9)  ;;  %vm579_vm1 = vcmask (!%p368_p9), 261120  }
  0x13   : > { %431 = vperm.xlu0 (!%p368_p9), %1860, %v425_v2   ;;  %441 = vperm.xlu1 (!%p368_p9), %1861, %v427_v3   ;;  %v556_v10 = vld [vmem:[%s2298_s4 + $0x8] sm:$0xff] (!%p368_p9)  ;;  %v557_v12 = vld [vmem:[%s2298_s4 + $0x10] sm:$0xff] (!%p368_p9)  ;;  %v558_v13 = vld [vmem:[%s2298_s4 + $0x18] sm:$0xff] (!%p368_p9)  ;;  %v1931_v50 = vmov (!%p368_p9), 0.0|0.0   ;;  %vm1932_vm2 = vmmov (!%p368_p9), 0   ;;  %v1933_v52 = vmov (!%p368_p9), 0.0  }
  0x14   : > { %v683_v14 = vld [vmem:[%s2300_s6] sm:$0xff] (!%p368_p9)  ;;  %v1588_v17 = vld [vmem:[%s2296_s2 + $0x28] sm:$0xff] (!%p368_p9)  ;;  %v1589_v18 = vld [vmem:[%s2296_s2 + $0x30] sm:$0xff] (!%p368_p9)  ;;  %s403_s29 = sand.u32 (!%p368_p9), 1, %s1920_s22  }
  0x15   : > { %v777_v15 = vld [vmem:[%s2302_s8] sm:$0xff] (!%p368_p9)  ;;  %v1590_v19 = vld [vmem:[%s2296_s2 + $0x38] sm:$0xff] (!%p368_p9)  ;;  %v1600_v21 = vld [vmem:[%s2298_s4 + $0x28] sm:$0xff] (!%p368_p9)  ;;  %s1569_s30 = sshll.u32 (!%p368_p9), %s403_s29, 3 }
  0x16   : > { %v1587_v16 = vld [vmem:[%s2296_s2 + $0x20] sm:$0xff] (!%p368_p9)  ;;  %v1601_v22 = vld [vmem:[%s2298_s4 + $0x30] sm:$0xff] (!%p368_p9)  ;;  %v1602_v23 = vld [vmem:[%s2298_s4 + $0x38] sm:$0xff] (!%p368_p9)  ;;  %s405_s16 = scalar_lea.vmem (!%p368_p9), [#allocation2], %s1569_s30 }
  0x17   : > { %v421_v0 = vld [vmem:[%s2314_s1] sm:$0xff] (!%p368_p9)  ;;  %v422_v7 = vld [vmem:[%s2314_s1 + $0x8] sm:$0xff] (!%p368_p9)  ;;  %436 = vperm.xlu0 (!%p368_p9), %1860, %v426_v4   ;;  %v423_v8 = vld [vmem:[%s2314_s1 + $0x10] sm:$0xff] (!%p368_p9)  ;;  %446 = vperm.xlu1 (!%p368_p9), %1861, %v428_v5   ;;  %s1479_s18 = sshll.u32 (!%p368_p9), %s405_s16, 4  ;;  %s1480_s18 = int_to_ptr.vmem [resolvable:$true] %s1479_s18 }
  0x18   : > { %1677 = vmatprep.mubr.msk.f32.mxu0 (!%p368_p9), %vm449_vm0, %v421_v0  ;;  %v424_v11 = vld [vmem:[%s2314_s1 + $0x18] sm:$0xff] (!%p368_p9)  ;;  %v1599_v20 = vld [vmem:[%s2298_s4 + $0x20] sm:$0xff] (!%p368_p9)  ;;  %v1609_v24 = vld [vmem:[%s2300_s6 + $0x10] sm:$0xff] (!%p368_p9)  ;;  %s1866_s30 = scalar_lea.vmem (!%p368_p9), %s1480_s18, 128 }
  0x19   : > { %s2060_s26 = scalar_select %p412_p10, %s2021_s25, 1  ;;  %v1614_v25 = vld [vmem:[%s2302_s8 + $0x8] sm:$0xff]  ;;  %v1610_v27 = vld [vmem:[%s2300_s6 + $0x18] sm:$0x1]  ;;  %v551_v28 = vld [vmem:[%s2297_s3] sm:$0xff] }
  0x1a   : > { %v684_v26 = vld [vmem:[%s2300_s6 + $0x8] sm:$0x1]  ;;  %1691 = vmatprep.mubr.msk.f32.mxu1 %vm579_vm1, %v551_v28  ;;  %v553_v48 = vld [vmem:[%s2297_s3 + $0x10] sm:$0xff]  ;;  %v554_v49 = vld [vmem:[%s2297_s3 + $0x18] sm:$0xff]  ;;  %p1867_p11 = scmp.ne.s32.totalorder %s1480_s18, %s1866_s30 }
  0x1b   : > { %s1570_s15 = sshll.u32 %s2060_s26, 3  ;;  %561 = vperm.xlu0 %1860, %v555_v9   ;;  %566 = vperm.xlu1 %1861, %v556_v10   ;;  %v552_v47 = vld [vmem:[%s2297_s3 + $0x8] sm:$0xff]  ;;  %v681_v51 = vld [vmem:[%s2299_s5] sm:$0xff]  ;;  %s1571_s23 = sshll.u32 %s2060_s26, 1 }
  0x1c   : > { %s415_s19 = scalar_lea.vmem %s2315_s0, %s1570_s15  ;;  %v682_v9 = vld [vmem:[%s2299_s5 + $0x8] sm:$0x1]  ;;  %v1583_v10 = vld [vmem:[%s2314_s1 + $0x20] sm:$0xff]  ;;  %s2237_s20 = scalar_lea.vmem %s2306_s12, %s1571_s23 }
  0x1d   : > { %v2072_v6 = vld [vmem:[%s415_s19] sm:$0xff]  ;;  %s1620_s23 = sshll.u32 %s2021_s25, 7  ;;  %s1462_s0 = scalar_lea.sflag [#allocation3], %s403_s29 }
  0x1e   : > { %1675 = vmatprep.subr.mxu0 %v2072_v6  ;;  %s2257_s28 = scalar_lea.hbm %s2305_s11, %s1620_s23  ;;  %p1868_p12 = pnand %p1867_p11, %p2038_p5 }
  0x1f   : > { %1676 = vmatpush3.msra.mxu0 %v2072_v6  ;;  %571 = vperm.xlu0 %1860, %v557_v12  }
  0x20   : > { %1678 = vmatmul.mubr.msk.f32.vlgmr.msra.gmra.mrb[0].mxu0 %vm449_vm0, %v422_v7  ;;  %576 = vperm.xlu1 %1861, %v558_v13   ;;  %p1869_p13 = pneg %p1868_p12 }
  0x21   : > { %1680 = vmatprep.mubr.msk.f32.mxu0 %vm449_vm0, %v423_v8  ;;  %v776_v8 = vld [vmem:[%s2301_s7] sm:$0xff] }
  0x23   : > { %687 = vperm.xlu0 %1860, %v683_v14  }
  0x24   : > { %1681 = vmatmul.mubr.msk.f32.gmra.mrb[2].mxu0 %vm449_vm0, %v424_v11  ;;  %780 = vperm.xlu1 %1861, %v777_v15  }
  0x25   : > { %1705 = vmatprep.mubr.msk.f32.mxu0 %vm579_vm1, %v681_v51 }
  0x27   : > { %873 = vperm.xlu0 %1860, %v1587_v16  }
  0x28   : > { %878 = vperm.xlu1 %1861, %v1588_v17  }
  0x2b   : > { %883 = vperm.xlu0 %1860, %v1589_v18  }
  0x2c   : > { %888 = vperm.xlu1 %1861, %v1590_v19  }
  0x2f   : > { %1004 = vperm.xlu0 %1860, %v1599_v20  }
  0x30   : > { %1009 = vperm.xlu1 %1861, %v1600_v21  }
  0x33   : > { %1014 = vperm.xlu0 %1860, %v1601_v22  }
  0x34   : > { %1019 = vperm.xlu1 %1861, %v1602_v23   ;;  %v1584_v23 = vld [vmem:[%s2314_s1 + $0x28] sm:$0xff] }
  0x37   : > { %1131 = vperm.xlu0 %1860, %v1609_v24   ;;  %v1585_v24 = vld [vmem:[%s2314_s1 + $0x30] sm:$0xff] }
  0x38   : > { %1226 = vperm.xlu1 %1861, %v1614_v25   ;;  %v1595_v25 = vld [vmem:[%s2297_s3 + $0x20] sm:$0xff] }
  0x3b   : > { %692 = vperm.xlu0 %1860, %v684_v26  }
  0x3c   : > { %1136 = vperm.xlu1 %1861, %v1610_v27  }
  0x92   : > { %v432_v29 = vpop.permute.xlu0 %431  ;;  %v442_v30 = vpop.permute.xlu1 %441 }
  0x96   : > { %v437_v31 = vpop.permute.xlu0 %436  ;;  %v447_v37 = vpop.permute.xlu1 %446 }
  0x9a   : > { %v567_v53 = vpop.permute.xlu1 %566  ;;  %v562_v54 = vpop.permute.xlu0 %561 }
  0x9e   : > { %v572_v63 = vpop.permute.xlu0 %571 }
  0x9f   : > { %v577_v60 = vpop.permute.xlu1 %576 }
  0xa2   : > { %v688_v14 = vpop.permute.xlu0 %687 }
  0xa3   : > { %v781_v19 = vpop.permute.xlu1 %780 }
  0xa6   : > { %v874_v27 = vpop.permute.xlu0 %873 }
  0xa7   : > { %v879_v26 = vpop.permute.xlu1 %878 }
  0xf3   : > { %v1679_v32 = vpop.f32.mrb[0].mxu0 }
  0xf4   : > { %v534_v33 = vadd.f32 %v1679_v32, %v437_v31  ;;  %v528_v34 = vpop.f32.mrb[1].mxu0 }
  0xf5   : > { %v529_v35 = vadd.f32 %v528_v34, %v432_v29 }
  0xf6   : > { %v548_v36 = vmax.f32 %v534_v33, 0.0  ;;  %v889_v33 = vpop.permute.xlu1 %888 }
  0xf7   : > { %v547_v38 = vmax.f32 %v529_v35, 0.0  ;;  %v1682_v39 = vpop.f32.mrb[2].mxu0 }
  0xf8   : > { %v544_v40 = vadd.f32 %v1682_v39, %v447_v37  ;;  %v538_v41 = vpop.f32.mrb[3].mxu0 }
  0xf9   : > { %v539_v42 = vadd.f32 %v538_v41, %v442_v30  ;;  %v1773_v43 = vpack.c.bf16 %v548_v36, %v547_v38  ;;  %v884_v36 = vpop.permute.xlu0 %883 }
  0xfa   : > { %v550_v44 = vmax.f32 %v544_v40, 0.0 }
  0xfb   : > { %v549_v45 = vmax.f32 %v539_v42, 0.0  ;;  %1774 = vmatprep.subr.bf16.mxu1 %v1773_v43 }
  0xfc   : > { %1776 = vmatpush3.bf16.msra.mxu1 %v1773_v43 }
  0xfd   : > { %v1777_v46 = vpack.c.bf16 %v550_v44, %v549_v45  ;;  %v1596_v44 = vld [vmem:[%s2297_s3 + $0x28] sm:$0xff]  ;;  %v1597_v45 = vld [vmem:[%s2297_s3 + $0x30] sm:$0xff] }
  0xff   : > { %1778 = vmatprep.subr.bf16.mxu1 %v1777_v46 }
 0x100   : > { %1780 = vmatpush3.bf16.msra.mxu1 %v1777_v46  ;;  %v1598_v46 = vld [vmem:[%s2297_s3 + $0x38] sm:$0xff] }
 0x101   : > { %1789 = vmatprep.subr.bf16.mxu1 %v1931_v50 }
 0x103   : > { %1692 = vmatmul.mubr.msk.f32.vlgmr.msra.gmra.mrb[0].mxu1 %vm579_vm1, %v552_v47  ;;  %v1607_v47 = vld [vmem:[%s2299_s5 + $0x10] sm:$0xff] }
 0x104   : > { %1694 = vmatprep.mubr.msk.f32.mxu1 %vm579_vm1, %v553_v48  ;;  %v1010_v48 = vpop.permute.xlu1 %1009 }
 0x107   : > { %1695 = vmatmul.mubr.msk.f32.gmra.mrb[2].mxu1 %vm579_vm1, %v554_v49  ;;  %v1005_v49 = vpop.permute.xlu0 %1004 }
 0x108   : > { %1716 = vmatprep.mubr.msk.f32.mxu1 %vm1932_vm2, %v1933_v52 }
 0x1d6   : > { %v1693_v55 = vpop.f32.mrb[0].mxu1 }
 0x1d7   : > { %v664_v56 = vadd.f32 %v1693_v55, %v567_v53  ;;  %v658_v57 = vpop.f32.mrb[1].mxu1 }
 0x1d8   : > { %v659_v58 = vadd.f32 %v658_v57, %v562_v54  ;;  %v1020_v57 = vpop.permute.xlu1 %1019 }
 0x1d9   : > { %v678_v59 = vmax.f32 %v664_v56, 0.0 }
 0x1da   : > { %v677_v61 = vmax.f32 %v659_v58, 0.0  ;;  %v1696_v62 = vpop.f32.mrb[2].mxu1 }
 0x1db   : > { %v674_v0 = vadd.f32 %v1696_v62, %v577_v60  ;;  %v668_v1 = vpop.f32.mrb[3].mxu1  ;;  %v1015_v60 = vpop.permute.xlu0 %1014 }
 0x1dc   : > { %v1781_v2 = vpack.c.bf16 %v678_v59, %v677_v61  ;;  %v669_v3 = vadd.f32 %v668_v1, %v572_v63 }
 0x1dd   : > { %v680_v4 = vmax.f32 %v674_v0, 0.0 }
 0x1de   : > { %v679_v5 = vmax.f32 %v669_v3, 0.0  ;;  %1782 = vmatprep.subr.bf16.mxu0 %v1781_v2  ;;  %1791 = vmatpush3.bf16.msra.mxu1 %v1781_v2 }
 0x1df   : > { %1784 = vmatpush3.bf16.msra.mxu0 %v1781_v2  ;;  %1792 = vmatprep.subr.bf16.mxu1 %v1931_v50 }
 0x1e0   : > { %v1785_v7 = vpack.c.bf16 %v680_v4, %v679_v5  ;;  %v1613_v4 = vld [vmem:[%s2301_s7 + $0x8] sm:$0xff]  ;;  %v1608_v5 = vld [vmem:[%s2299_s5 + $0x18] sm:$0x1] }
 0x1e2   : > { %1786 = vmatprep.subr.bf16.mxu0 %v1785_v7  ;;  %1794 = vmatpush3.bf16.msra.mxu1 %v1785_v7 }
 0x1e3   : > { %1788 = vmatpush3.bf16.msra.mxu0 %v1785_v7  ;;  %v1227_v7 = vpop.permute.xlu1 %1226 }
 0x1e5   : > { %1717 = vmatmul.mubr.msk.f32.vlgmr.msra.gmra.mrb[4].mxu1 %vm579_vm1, %v776_v8 }
 0x1e6   : > { %1706 = vmatmul.mubr.msk.f32.vlgmr.msra.gmra.mrb[4].mxu0 %vm579_vm1, %v682_v9  ;;  %1749 = vmatprep.mubr.msk.f32.mxu1 %vm579_vm1, %v1607_v47 }
 0x1e7   : > { %1721 = vmatprep.mubr.msk.f32.mxu0 %vm449_vm0, %v1583_v10  ;;  %v1137_v9 = vpop.permute.xlu1 %1136 }
 0x2b8   : > { %v852_v11 = vpop.f32.mrb[4].mxu1 }
 0x2b9   : > { %v2178_v12 = vpop.f32.mrb[4].mxu0  ;;  %v1718_v13 = vpop.f32.mrb[5].mxu1  ;;  %v853_v20 = vadd.f32 %v852_v11, %v781_v19 }
 0x2ba   : > { %v767_v15 = vpop.f32.mrb[5].mxu0 }
 0x2bb   : > { %v768_v16 = vadd.f32 %v767_v15, %v688_v14 }
 0x2bd   : > { %v857_v17 = vmul.f32 1.442695, %v768_v16 }
 0x2bf   : > { %1862 = vpow2.f32 %v857_v17 }
 0x2c9   : > { %v1863_v18 = vpop.eup %1862 }
 0x2ca   : > { %v859_v21 = vmul.f32 %v1863_v18, %v2072_v6  ;;  %v1586_v6 = vld [vmem:[%s2314_s1 + $0x38] sm:$0xff]  ;;  %s1934_s1 = smov [#allocation2]  }
 0x2cb   : > { %s1870_s15 = sshll.u32 %s1934_s1, 4  ;;  %s1871_s15 = int_to_ptr.vmem [resolvable:$false] %s1870_s15 }
 0x2cc   : > { %v2181_v22 = vadd.f32 %v859_v21, %v853_v20  ;;  %s1872_s17 = scalar_lea.vmem %s1871_s15, 256  ;;  %p1873_p0 = scmp.lt.s32.totalorder %s1480_s18, %s1871_s15 }
 0x2cd   : > { %p1874_p1 = scmp.lt.s32.totalorder %s1872_s17, %s1866_s30 }
 0x2ce   : > { %1719 = vmatprep.subr.mxu0 %v2181_v22 }
 0x2cf   : > { %1720 = vmatpush3.msra.mxu0 %v2181_v22  ;;  %p1875_p2 = por %p1874_p1, %p1873_p0 }
 0x2d0   : > { %1722 = vmatmul.mubr.msk.f32.vlgmr.msra.gmra.mrb[6].mxu0 %vm449_vm0, %v1584_v23 }
 0x2d1   : > { %1724 = vmatprep.mubr.msk.f32.mxu0 %vm449_vm0, %v1585_v24  ;;  %p1876_p3 = pnand %p1875_p2, %p1869_p13 }
 0x2d4   : > { %1725 = vmatmul.mubr.msk.f32.gmra.mrb[8].mxu0 %vm449_vm0, %v1586_v6 }
 0x2d5   : > { %1735 = vmatprep.mubr.msk.f32.mxu0 %vm579_vm1, %v1595_v25 }
 0x3a3   : > { %v1723_v28 = vpop.f32.mrb[6].mxu0 }
 0x3a4   : > { %v975_v29 = vadd.f32 %v1723_v28, %v879_v26  ;;  %v969_v30 = vpop.f32.mrb[7].mxu0  ;;  %v1382_v26 = vld [vmem:[%s2304_s10] sm:$0x1] }
 0x3a5   : > { %v970_v31 = vadd.f32 %v969_v30, %v874_v27 }
 0x3a6   : > { %v989_v32 = vmax.f32 %v975_v29, 0.0 }
 0x3a7   : > { %v988_v34 = vmax.f32 %v970_v31, 0.0  ;;  %v1726_v35 = vpop.f32.mrb[8].mxu0 }
 0x3a8   : > { %v985_v37 = vadd.f32 %v1726_v35, %v889_v33  ;;  %v979_v38 = vpop.f32.mrb[9].mxu0 }
 0x3a9   : > { %v1795_v39 = vpack.c.bf16 %v989_v32, %v988_v34  ;;  %v980_v40 = vadd.f32 %v979_v38, %v884_v36 }
 0x3aa   : > { %v991_v41 = vmax.f32 %v985_v37, 0.0 }
 0x3ab   : > { %v990_v42 = vmax.f32 %v980_v40, 0.0  ;;  %1796 = vmatprep.subr.bf16.mxu0 %v1795_v39 }
 0x3ac   : > { %1798 = vmatpush3.bf16.msra.mxu0 %v1795_v39 }
 0x3ad   : > { %v1799_v43 = vpack.c.bf16 %v991_v41, %v990_v42 }
 0x3af   : > { %1800 = vmatprep.subr.bf16.mxu0 %v1799_v43 }
 0x3b0   : > { %1802 = vmatpush3.bf16.msra.mxu0 %v1799_v43 }
 0x3b1   : > { %1811 = vmatprep.subr.bf16.mxu0 %v1931_v50 }
 0x3b3   : > { %1736 = vmatmul.mubr.msk.f32.vlgmr.msra.gmra.mrb[10].mxu0 %vm579_vm1, %v1596_v44 }
 0x3b4   : > { %1738 = vmatprep.mubr.msk.f32.mxu0 %vm579_vm1, %v1597_v45 }
 0x3b7   : > { %1739 = vmatmul.mubr.msk.f32.gmra.mrb[12].mxu0 %vm579_vm1, %v1598_v46 }
 0x3b8   : > { %1760 = vmatprep.mubr.msk.f32.mxu0 %vm1932_vm2, %v1933_v52 }
 0x486   : > { %v1737_v51 = vpop.f32.mrb[10].mxu0 }
 0x487   : > { %v1106_v53 = vadd.f32 %v1737_v51, %v1010_v48  ;;  %v1100_v54 = vpop.f32.mrb[11].mxu0 }
 0x488   : > { %v1101_v55 = vadd.f32 %v1100_v54, %v1005_v49 }
 0x489   : > { %v1120_v56 = vmax.f32 %v1106_v53, 0.0 }
 0x48a   : > { %v1119_v58 = vmax.f32 %v1101_v55, 0.0  ;;  %v1740_v59 = vpop.f32.mrb[12].mxu0 }
 0x48b   : > { %v1116_v61 = vadd.f32 %v1740_v59, %v1020_v57  ;;  %v1110_v62 = vpop.f32.mrb[13].mxu0 }
 0x48c   : > { %v1803_v63 = vpack.c.bf16 %v1120_v56, %v1119_v58  ;;  %v1111_v0 = vadd.f32 %v1110_v62, %v1015_v60 }
 0x48d   : > { %v1122_v1 = vmax.f32 %v1116_v61, 0.0 }
 0x48e   : > { %v1121_v2 = vmax.f32 %v1111_v0, 0.0  ;;  %1804 = vmatprep.subr.bf16.mxu1 %v1803_v63  ;;  %1813 = vmatpush3.bf16.msra.mxu0 %v1803_v63 }
 0x48f   : > { %1806 = vmatpush3.bf16.msra.mxu1 %v1803_v63  ;;  %1814 = vmatprep.subr.bf16.mxu0 %v1931_v50  ;;  %v1132_v50 = vpop.permute.xlu0 %1131 }
 0x490   : > { %v1807_v3 = vpack.c.bf16 %v1122_v1, %v1121_v2 }
 0x492   : > { %1808 = vmatprep.subr.bf16.mxu1 %v1807_v3  ;;  %1816 = vmatpush3.bf16.msra.mxu0 %v1807_v3 }
 0x493   : > { %1810 = vmatpush3.bf16.msra.mxu1 %v1807_v3  ;;  %v693_v8 = vpop.permute.xlu0 %692 }
 0x494   : > { %1763 = vmatprep.subr.mxu1 %v1933_v52  ;;  %v773_v14 = vadd.f32 %v2178_v12, %v693_v8  ;;  %v1307_v12 = vld [vmem:[%s2303_s9] sm:$0xff] }
 0x495   : > { %1761 = vmatmul.mubr.msk.f32.vlgmr.msra.gmra.mrb[14].mxu0 %vm579_vm1, %v1613_v4 }
 0x496   : > { %1750 = vmatmul.mubr.msk.f32.vlgmr.msra.gmra.mrb[6].mxu1 %vm579_vm1, %v1608_v5 }
 0x497   : > { %1765 = vmatprep.mubr.msk.f32.mxu1 %vm1932_vm2, %v1933_v52 }
 0x568   : > { %v1298_v10 = vpop.f32.mrb[14].mxu0 }
 0x569   : > { %v1751_v11 = vpop.f32.mrb[6].mxu1  ;;  %v1762_v13 = vpop.f32.mrb[15].mxu0  ;;  %v1299_v21 = vadd.f32 %v1298_v10, %v1227_v7 }
 0x56a   : > { %v1217_v15 = vadd.f32 %v1751_v11, %v1137_v9  ;;  %v1211_v16 = vpop.f32.mrb[7].mxu1 }
 0x56b   : > { %v1212_v17 = vadd.f32 %v1211_v16, %v1132_v50 }
 0x56c   : > { %v1302_v18 = vadd.f32 %v1217_v15, %v773_v14 }
 0x56d   : > { %v1303_v19 = vmul.f32 1.442695, %v1212_v17 }
 0x56e   : > { %1459 = vst [vmem:[%s2237_s20] sm:$0x1] %v1302_v18 }
 0x56f   : > { %1864 = vpow2.f32 %v1303_v19 }
 0x579   : > { %v1865_v20 = vpop.eup %1864 }
 0x57a   : > { %v1305_v23 = vmul.f32 %v1865_v20, %v2181_v22 }
 0x57c   : > { %v1306_v24 = vadd.f32 %v1305_v23, %v1299_v21 }
 0x57e   : > { %1764 = vmatpush3.msra.mxu1 %v1306_v24 }
 0x57f   : > { %1766 = vmatmul.mubr.msk.f32.vlgmr.msra.gmra.mrb[8].mxu1 %vm449_vm0, %v1307_v12  ;;  %1768 = vmatprep.subr.mxu1 %v1933_v52 }
 0x580   : > { %1770 = vmatprep.mubr.msk.f32.mxu1 %vm1932_vm2, %v1933_v52 }
 0x652   : > { %v1377_v6 = vpop.f32.mrb[8].mxu1 }
 0x653   : > { %1381 = vst [vmem:[%s405_s16] sm:$0xff] %v1377_v6  ;;  %v1383_v22 = vmul.f32 %v1377_v6, %v1377_v6  ;;  %v1767_v25 = vpop.f32.mrb[9].mxu1 }
 0x655   : > { %1769 = vmatpush3.msra.mxu1 %v1383_v22 }
 0x656   : > { %1771 = vmatmul.mubr.msk.f32.vlgmr.msra.gmra.mrb[10].mxu1 %vm449_vm0, %v1382_v26 }
 0x657   : > { %1879 = shalt.err (!%p1876_p3)
}
 0x658   : > { %s1880_s25 = scalar_lea.hbm %s2257_s28, 128  ;;  %s1884_s1 = scalar_lea.hbm %s2305_s11, 256 }
 0x659   : > { %p1881_p4 = scmp.ne.s32.totalorder %s2257_s28, %s1880_s25  ;;  %p1885_p9 = scmp.lt.u32.totalorder %s2257_s28, %s2305_s11 }
 0x65a   : > { %p1886_p10 = scmp.lt.u32.totalorder %s1884_s1, %s1880_s25  ;;  %p1888_p12 = scmp.lt.u32.totalorder %s1880_s25, %s2257_s28 }
 0x65b   : > { %p1882_p7 = pnand %p1881_p4, %p2038_p5 }
 0x65c   : > { %p1887_p11 = por %p1886_p10, %p1885_p9 }
 0x65d   : > { %p1883_p8 = pneg %p1882_p7 }
 0x65e   : > { %p1889_p13 = por %p1888_p12, %p1887_p11 }
 0x660   : > { %p1890_p0 = pnand %p1889_p13, %p1883_p8 }
 0x662   : > { %1893 = shalt.err (!%p1890_p0)
}
 0x663   : > { %1817 = dma.vmem_to_hbm [thread:$0]  (%p2038_p5), %s1480_s18, 128, %s2257_s28, %s1462_s0  }
 0x729   : > { %v1453_v52 = vpop.f32.mrb[10].mxu1 }
 0x72a   : > { %v1457_v27 = vmul.f32 -0.5, %v1453_v52  ;;  %v1772_v28 = vpop.f32.mrb[11].mxu1 }
 0x72c   : > { %v1618_v29 = vadd.f32 -7.351508, %v1457_v27 }
 0x72e   : > { %1460 = vst [vmem:[%s2237_s20 + $0x1] sm:$0x1] %v1618_v29 }
 0x72f PF: > { %p1823_p1 = scmp.ge.s32.totalorder %s1928_s24, 2  ;;  %s1494_s26 = sand.u32 1, %s1916_s21  }
 0x730   : > { %s1495_s30 = scalar_lea.sflag [#allocation3], %s1494_s26 }
 0x731   : > { %p1820_p2 = pnand %p1823_p1, %p2042_p6 }
 0x733   : > { %1911 = dma.done.wait (!%p1820_p2), %s1495_s30, 128  }
 0x734   : > { %1913 = vsyncadd (!%p1820_p2), %s1495_s30, 4294967168  ;;  %s2316_s13 = sld [smem:[#allocation5_spill]]  ;;  %s2317_s23 = sld [smem:[#allocation6_spill]] }
 0x735   : > { %p23_p5 = scmp.ge.s32.totalorder %s2025_s27, 4   ;;  %s2318_s21 = smov %s1920_s22 }
 0x736   : > { %s2320_s24 = smov %s2025_s27 }
 0x737   :  { %25 = sbr.rel (!%p23_p5) target bundleno = 6 (0x6), region = 119 }
 0x73a   : > { %s2319_s22 = smov %s2316_s13 }
 0x73e   :  { %1507 = vsyncpa [#allocation3], 1 }
 0x73f   :  { %1509 = vsyncpa [#allocation3 + $0x1], 1 }

</bundles_post_ra>
